<compile_context>
chip_gen: v5e
topology: v5e:2x2
jax: 0.10.0
libtpu: 0.0.40
codegen_flags: <defaults>
</compile_context>

<pallas_src>
import functools
import math

import jax
import jax.numpy as jnp
from jax import lax
from jax.experimental import pallas as pl
from jax.experimental.pallas import tpu as pltpu


def _round_up(x, m):
    return ((x + m - 1) // m) * m


def _proxy_anchor_kernel(xn_ref, p_ref, t_ref, pos_ref, neg_ref, valid_ref, *,
                         nb_classes, c_padded, batch, b_padded, block_c,
                         mrg, alpha, approx_recip):
    i = pl.program_id(0)
    tile_off = i * block_c

    xn = xn_ref[...]                                    # [B_pad, D] matmul dtype
    p = p_ref[...].astype(jnp.float32)                  # [block_c, D] f32

    # l2-normalize the proxy tile: rsqrt on [block_c, 1] (EUP) + one VPU mul.
    inv_norm = lax.rsqrt(jnp.sum(p * p, axis=1, keepdims=True) + 1e-12)
    pn = (p * inv_norm).astype(xn.dtype)

    # cos[b, c]: contract the shared embedding (lane) axis of BOTH operands
    # directly -- no transpose of the proxy tile before the MXU.
    cos = lax.dot_general(
        xn, pn,
        dimension_numbers=(((1,), (1,)), ((), ())),
        preferred_element_type=jnp.float32)             # [B_pad, block_c] f32

    B = cos.shape[0]
    class_ids = tile_off + lax.broadcasted_iota(jnp.int32, (B, block_c), 1)
    is_pos = class_ids == t_ref[...]                    # [B_pad, block_c] bool

    # One transcendental per tile; positive branch via reciprocal (EUP slot).
    neg_exp = jnp.exp(alpha * (cos + mrg))
    pos_exp = math.exp(2.0 * alpha * mrg) * pl.reciprocal(
        neg_exp, approx=approx_recip)

    # Single select per branch (no cast / extra multiplies).
    pos_masked = jnp.where(is_pos, pos_exp, 0.0)
    neg_masked = jnp.where(is_pos, 0.0, neg_exp)
    if b_padded != batch:
        # zero-padded batch rows (label == -1) must not contribute negatives
        neg_masked = jnp.where(t_ref[...] >= 0, neg_masked, 0.0)

    p_sim = jnp.sum(pos_masked, axis=0, keepdims=True)          # [1, block_c]
    n_sim = jnp.sum(neg_masked, axis=0, keepdims=True)          # [1, block_c]
    n_pos = jnp.sum(is_pos.astype(jnp.float32), axis=0, keepdims=True)

    if c_padded != nb_classes:
        # zero-padded proxy columns contribute nothing; mask the REDUCED sum.
        col_ids = tile_off + lax.broadcasted_iota(jnp.int32, (1, block_c), 1)
        n_sim = n_sim * (col_ids < nb_classes).astype(jnp.float32)

    pos_ref[...] = jnp.log(1.0 + p_sim).reshape(pos_ref.shape)
    neg_ref[...] = jnp.log(1.0 + n_sim).reshape(neg_ref.shape)
    # validity from the label mask itself (robust to exp overflow).
    valid_ref[...] = (n_pos > 0.0).astype(jnp.float32).reshape(valid_ref.shape)


def proxy_anchor_loss(X, T, proxies, *, mrg=0.1, alpha=32, block_c=None,
                      matmul_dtype=jnp.float32, approx_reciprocal=None):
    B, D = X.shape
    C, Dp = proxies.shape
    assert D == Dp

    if approx_reciprocal is None:
        # approx vrcp only where inputs are already rounded (bf16 MXU path).
        approx_reciprocal = (matmul_dtype == jnp.bfloat16)

    # l2-normalize X once (one tiny XLA op), then cast to the streaming dtype.
    Xf = X.astype(jnp.float32)
    xn = (Xf * lax.rsqrt(jnp.sum(Xf * Xf, axis=1, keepdims=True) + 1e-12))
    xn = xn.astype(matmul_dtype)

    # Pad batch to full sublanes (8); padded labels are -1 and masked in-kernel.
    b_pad = _round_up(B, 8)
    T2 = T.reshape(B, 1).astype(jnp.int32)
    if b_pad != B:
        xn = jnp.pad(xn, ((0, b_pad - B), (0, 0)))
        T2 = jnp.pad(T2, ((0, b_pad - B), (0, 0)), constant_values=-1)

    # Class-tile size: lane-dense (multiple of 128); default 1024 amortizes the
    # ~0.35 us per-step pipeline overhead while keeping VMEM small
    # (2 x 1024 x D proxy buffers + a few [B, block_c] f32 intermediates).
    if block_c is None:
        block_c = 1024
    block_c = min(_round_up(block_c, 128), _round_up(C, 128))
    c_pad = _round_up(C, block_c)

    # Stream the proxies in matmul_dtype (half the HBM bytes on the bf16 path).
    P = proxies.astype(matmul_dtype)
    if c_pad != C:
        P = jnp.pad(P, ((0, c_pad - C), (0, 0)))
    num_tiles = c_pad // block_c

    kernel = functools.partial(
        _proxy_anchor_kernel,
        nb_classes=C, c_padded=c_pad, batch=B, b_padded=b_pad,
        block_c=block_c, mrg=float(mrg), alpha=float(alpha),
        approx_recip=bool(approx_reciprocal))

    # Rough VMEM budget: resident xn + labels, double-buffered proxy tile,
    # per-tile outputs, and a few [B, block_c] f32 intermediates.
    itemsize = jnp.dtype(matmul_dtype).itemsize
    est = (2 * b_pad * D * itemsize            # resident xn (buffered)
           + 2 * b_pad * 4                     # labels
           + 2 * block_c * D * itemsize        # proxy tile, double-buffered
           + 3 * 2 * block_c * 4               # outputs, double-buffered
           + 8 * b_pad * block_c * 4)          # [B, block_c] f32 intermediates
    vmem_limit = max(32 * 1024 * 1024, min(2 * est, 64 * 1024 * 1024))
    # TODO(synk): for very large B (e.g. 4k x 1k f32) add an outer batch-tile
    # grid axis instead of keeping xn fully resident (v7x has only 64 MiB VMEM).

    out_sd = jax.ShapeDtypeStruct((num_tiles, 1, block_c), jnp.float32)

    def _out_spec():
        return pl.BlockSpec((1, 1, block_c), lambda i: (i, 0, 0))

    grid_spec = pltpu.PrefetchScalarGridSpec(
        num_scalar_prefetch=0,
        grid=(num_tiles,),
        in_specs=[
            pl.BlockSpec((b_pad, D), lambda i: (0, 0)),        # xn: resident
            pl.BlockSpec((block_c, D), lambda i: (i, 0)),      # proxy tile
            pl.BlockSpec((b_pad, 1), lambda i: (0, 0)),        # labels: resident
        ],
        out_specs=[_out_spec(), _out_spec(), _out_spec()],
    )

    pos_log, neg_log, valid = pl.pallas_call(
        kernel,
        out_shape=(out_sd, out_sd, out_sd),
        grid_spec=grid_spec,
        compiler_params=pltpu.CompilerParams(
            # Each class lives in exactly one tile, so the class axis is fully
            # independent -> "parallel" (megacore-shardable on v7x).
            dimension_semantics=("parallel",),
            vmem_limit_bytes=int(vmem_limit),
        ),
    )(xn, P, T2)

    # Tiny final reduce in XLA (padded class slots are exact zeros).
    num_valid = jnp.sum(valid)
    pos_term = jnp.sum(pos_log) / num_valid
    neg_term = jnp.sum(neg_log) / float(C)
    return pos_term + neg_term


def _reference_loss(X, T, proxies, mrg=0.1, alpha=32):
    # Pure-JAX reference mirroring the PyTorch forward.
    def l2n(a):
        return a / jnp.sqrt(jnp.sum(a * a, axis=1, keepdims=True) + 1e-12)

    C = proxies.shape[0]
    cos = l2n(X) @ l2n(proxies).T
    p_one_hot = jax.nn.one_hot(T, C, dtype=jnp.float32)
    pos_exp = jnp.exp(-alpha * (cos - mrg))
    neg_exp = jnp.exp(alpha * (cos + mrg))
    p_sim_sum = jnp.sum(jnp.where(p_one_hot == 1, pos_exp, 0.0), axis=0)
    n_sim_sum = jnp.sum(jnp.where(p_one_hot == 0, neg_exp, 0.0), axis=0)
    num_valid = jnp.sum((p_one_hot.sum(axis=0) != 0).astype(jnp.float32))
    pos_term = jnp.sum(jnp.log(1.0 + p_sim_sum)) / num_valid
    neg_term = jnp.sum(jnp.log(1.0 + n_sim_sum)) / C
    return pos_term + neg_term


if __name__ == "__main__":
    nb_classes = 16
    sz_embed = 32
    batch = 8

    key = jax.random.PRNGKey(0)
    kx, kt, kp, kt2, kx2, kt3 = jax.random.split(key, 6)

    X = jax.random.normal(kx, (batch, sz_embed), dtype=jnp.float32)
    T = jax.random.randint(kt, (batch,), 0, nb_classes, dtype=jnp.int32)

    # proxies ~ kaiming_normal_(mode='fan_out'): std = sqrt(2 / nb_classes)
    proxies = jax.random.normal(kp, (nb_classes, sz_embed), dtype=jnp.float32) * jnp.sqrt(
        2.0 / nb_classes
    )

    # 1) f32 MXU path (single 128-wide class tile, class padding exercised).
    loss = proxy_anchor_loss(X, T, proxies, mrg=0.1, alpha=32)
    loss = jax.block_until_ready(loss)
    ref = _reference_loss(X, T, proxies, mrg=0.1, alpha=32)
    assert jnp.allclose(loss, ref, rtol=1e-4, atol=1e-4), (loss, ref)

    # 2) bf16-streamed proxies + bf16 MXU + approx reciprocal; alpha amplifies
    #    cosine rounding, so compare against the f32 reference loosely.
    loss_bf16 = proxy_anchor_loss(X, T, proxies, mrg=0.1, alpha=32,
                                  matmul_dtype=jnp.bfloat16)
    loss_bf16 = jax.block_until_ready(loss_bf16)
    assert jnp.allclose(loss_bf16, ref, rtol=1e-1, atol=1e-1), (loss_bf16, ref)

    # 3) multi-tile class grid (C=200 -> padded to 256, two 128-wide tiles,
    #    fully parallel grid axis + per-tile partial outputs).
    C2 = 200
    proxies2 = jax.random.normal(kp, (C2, sz_embed), dtype=jnp.float32) * jnp.sqrt(
        2.0 / C2)
    T2 = jax.random.randint(kt2, (batch,), 0, C2, dtype=jnp.int32)
    loss_mt = proxy_anchor_loss(X, T2, proxies2, mrg=0.1, alpha=32, block_c=128)
    loss_mt = jax.block_until_ready(loss_mt)
    ref_mt = _reference_loss(X, T2, proxies2, mrg=0.1, alpha=32)
    assert jnp.allclose(loss_mt, ref_mt, rtol=1e-4, atol=1e-4), (loss_mt, ref_mt)

    # 4) batch not a multiple of 8 -> exercises batch padding + row masking.
    B3 = 6
    X3 = jax.random.normal(kx2, (B3, sz_embed), dtype=jnp.float32)
    T3 = jax.random.randint(kt3, (B3,), 0, nb_classes, dtype=jnp.int32)
    loss_bp = proxy_anchor_loss(X3, T3, proxies, mrg=0.1, alpha=32)
    loss_bp = jax.block_until_ready(loss_bp)
    ref_bp = _reference_loss(X3, T3, proxies, mrg=0.1, alpha=32)
    assert jnp.allclose(loss_bp, ref_bp, rtol=1e-4, atol=1e-4), (loss_bp, ref_bp)

    print("KERNEL_OK")
</pallas_src>

<mosaic_0001>
module attributes {stable_mosaic.version = 11 : i64} {
  func.func @_proxy_anchor_kernel(%arg0: i32, %arg1: memref<8x32xf32, #tpu.memory_space<vmem>>, %arg2: memref<128x32xf32, #tpu.memory_space<vmem>>, %arg3: memref<8x1xi32, #tpu.memory_space<vmem>>, %arg4: memref<1x1x128xf32, #tpu.memory_space<vmem>>, %arg5: memref<1x1x128xf32, #tpu.memory_space<vmem>>, %arg6: memref<1x1x128xf32, #tpu.memory_space<vmem>>) attributes {dimension_semantics = [#tpu.dimension_semantics<parallel>], iteration_bounds = array<i64: 1>, scalar_prefetch = 0 : i64, scratch_operands = 0 : i64, tpu.core_type = #tpu.core_type<tc>, window_params = [{pipeline_mode = #tpu.pipeline_mode<synchronous>, transform_indices = @transform_0, window_bounds = array<i64: 8, 32>}, {transform_indices = @transform_1, window_bounds = array<i64: 128, 32>}, {pipeline_mode = #tpu.pipeline_mode<synchronous>, transform_indices = @transform_2, window_bounds = array<i64: 8, 1>}, {transform_indices = @transform_3, window_bounds = array<i64: 1, 1, 128>}, {transform_indices = @transform_4, window_bounds = array<i64: 1, 1, 128>}, {transform_indices = @transform_5, window_bounds = array<i64: 1, 1, 128>}]} {
    %c128_i32 = arith.constant 128 : i32
    %0 = arith.muli %arg0, %c128_i32 : i32
    %c0 = arith.constant 0 : index
    %c0_0 = arith.constant 0 : index
    %1 = vector.load %arg1[%c0, %c0_0] : memref<8x32xf32, #tpu.memory_space<vmem>>, vector<8x32xf32>
    %c0_1 = arith.constant 0 : index
    %c0_2 = arith.constant 0 : index
    %2 = vector.load %arg2[%c0_1, %c0_2] : memref<128x32xf32, #tpu.memory_space<vmem>>, vector<128x32xf32>
    %3 = arith.mulf %2, %2 : vector<128x32xf32>
    %cst = arith.constant dense<0.000000e+00> : vector<128xf32>
    %4 = vector.multi_reduction <add>, %3, %cst [1] : vector<128x32xf32> to vector<128xf32>
    %5 = vector.shape_cast %4 : vector<128xf32> to vector<128x1xf32>
    %cst_3 = arith.constant 9.99999996E-13 : f32
    %6 = vector.broadcast %cst_3 : f32 to vector<128x1xf32>
    %7 = arith.addf %5, %6 : vector<128x1xf32>
    %8 = math.rsqrt %7 : vector<128x1xf32>
    %9 = vector.broadcast %8 : vector<128x1xf32> to vector<128x32xf32>
    %10 = arith.mulf %2, %9 : vector<128x32xf32>
    %cst_4 = arith.constant dense<0.000000e+00> : vector<8x128xf32>
    %11 = tpu.matmul %1, %10, %cst_4 {dimension_numbers = #tpu.dot_dimension_numbers<[1], [1], [0], [0], [0, 0, 1, 0], [], []>} : vector<8x32xf32>, vector<128x32xf32>, vector<8x128xf32> -> vector<8x128xf32>
    %12 = tpu.iota {dimensions = array<i32: 1>} : vector<8x128xi32>
    %13 = vector.broadcast %0 : i32 to vector<8x128xi32>
    %14 = arith.addi %13, %12 : vector<8x128xi32>
    %c0_5 = arith.constant 0 : index
    %c0_6 = arith.constant 0 : index
    %15 = vector.load %arg3[%c0_5, %c0_6] : memref<8x1xi32, #tpu.memory_space<vmem>>, vector<8x1xi32>
    %16 = vector.broadcast %15 : vector<8x1xi32> to vector<8x128xi32>
    %17 = arith.cmpi eq, %14, %16 : vector<8x128xi32>
    %cst_7 = arith.constant 1.000000e-01 : f32
    %18 = vector.broadcast %cst_7 : f32 to vector<8x128xf32>
    %19 = arith.addf %11, %18 : vector<8x128xf32>
    %cst_8 = arith.constant 3.200000e+01 : f32
    %20 = vector.broadcast %cst_8 : f32 to vector<8x128xf32>
    %21 = arith.mulf %20, %19 : vector<8x128xf32>
    %22 = math.exp %21 : vector<8x128xf32>
    %23 = tpu.reciprocal %22 : vector<8x128xf32> -> vector<8x128xf32>
    %cst_9 = arith.constant 601.845032 : f32
    %24 = vector.broadcast %cst_9 : f32 to vector<8x128xf32>
    %25 = arith.mulf %24, %23 : vector<8x128xf32>
    %cst_10 = arith.constant 0.000000e+00 : f32
    %26 = vector.broadcast %cst_10 : f32 to vector<8x128xf32>
    %27 = arith.select %17, %25, %26 : vector<8x128xi1>, vector<8x128xf32>
    %cst_11 = arith.constant 0.000000e+00 : f32
    %28 = vector.broadcast %cst_11 : f32 to vector<8x128xf32>
    %29 = arith.select %17, %28, %22 : vector<8x128xi1>, vector<8x128xf32>
    %cst_12 = arith.constant dense<0.000000e+00> : vector<128xf32>
    %30 = vector.multi_reduction <add>, %27, %cst_12 [0] : vector<8x128xf32> to vector<128xf32>
    %31 = vector.shape_cast %30 : vector<128xf32> to vector<1x128xf32>
    %cst_13 = arith.constant dense<0.000000e+00> : vector<128xf32>
    %32 = vector.multi_reduction <add>, %29, %cst_13 [0] : vector<8x128xf32> to vector<128xf32>
    %33 = vector.shape_cast %32 : vector<128xf32> to vector<1x128xf32>
    %34 = arith.extui %17 : vector<8x128xi1> to vector<8x128xi32>
    %35 = arith.sitofp %34 : vector<8x128xi32> to vector<8x128xf32>
    %cst_14 = arith.constant dense<0.000000e+00> : vector<128xf32>
    %36 = vector.multi_reduction <add>, %35, %cst_14 [0] : vector<8x128xf32> to vector<128xf32>
    %37 = vector.shape_cast %36 : vector<128xf32> to vector<1x128xf32>
    %38 = tpu.iota {dimensions = array<i32: 1>} : vector<1x128xi32>
    %39 = vector.broadcast %0 : i32 to vector<1x128xi32>
    %40 = arith.addi %39, %38 : vector<1x128xi32>
    %c16_i32 = arith.constant 16 : i32
    %41 = vector.broadcast %c16_i32 : i32 to vector<1x128xi32>
    %42 = arith.cmpi slt, %40, %41 : vector<1x128xi32>
    %43 = arith.extui %42 : vector<1x128xi1> to vector<1x128xi32>
    %44 = arith.sitofp %43 : vector<1x128xi32> to vector<1x128xf32>
    %45 = arith.mulf %33, %44 : vector<1x128xf32>
    %cst_15 = arith.constant 1.000000e+00 : f32
    %46 = vector.broadcast %cst_15 : f32 to vector<1x128xf32>
    %47 = arith.addf %46, %31 : vector<1x128xf32>
    %48 = math.log %47 : vector<1x128xf32>
    %49 = vector.shape_cast %48 : vector<1x128xf32> to vector<1x1x128xf32>
    %c0_16 = arith.constant 0 : index
    %c0_17 = arith.constant 0 : index
    %c0_18 = arith.constant 0 : index
    %50 = vector.load %arg4[%c0_16, %c0_17, %c0_18] : memref<1x1x128xf32, #tpu.memory_space<vmem>>, vector<1x1x128xf32>
    tpu.vector_store %arg4[%c0_16, %c0_17, %c0_18], %49 {strides = array<i32>} : memref<1x1x128xf32, #tpu.memory_space<vmem>>, vector<1x1x128xf32>,
    %cst_19 = arith.constant 1.000000e+00 : f32
    %51 = vector.broadcast %cst_19 : f32 to vector<1x128xf32>
    %52 = arith.addf %51, %45 : vector<1x128xf32>
    %53 = math.log %52 : vector<1x128xf32>
    %54 = vector.shape_cast %53 : vector<1x128xf32> to vector<1x1x128xf32>
    %c0_20 = arith.constant 0 : index
    %c0_21 = arith.constant 0 : index
    %c0_22 = arith.constant 0 : index
    %55 = vector.load %arg5[%c0_20, %c0_21, %c0_22] : memref<1x1x128xf32, #tpu.memory_space<vmem>>, vector<1x1x128xf32>
    tpu.vector_store %arg5[%c0_20, %c0_21, %c0_22], %54 {strides = array<i32>} : memref<1x1x128xf32, #tpu.memory_space<vmem>>, vector<1x1x128xf32>,
    %cst_23 = arith.constant 0.000000e+00 : f32
    %56 = vector.broadcast %cst_23 : f32 to vector<1x128xf32>
    %57 = arith.cmpf ogt, %37, %56 : vector<1x128xf32>
    %58 = arith.extui %57 : vector<1x128xi1> to vector<1x128xi32>
    %59 = arith.sitofp %58 : vector<1x128xi32> to vector<1x128xf32>
    %60 = vector.shape_cast %59 : vector<1x128xf32> to vector<1x1x128xf32>
    %c0_24 = arith.constant 0 : index
    %c0_25 = arith.constant 0 : index
    %c0_26 = arith.constant 0 : index
    %61 = vector.load %arg6[%c0_24, %c0_25, %c0_26] : memref<1x1x128xf32, #tpu.memory_space<vmem>>, vector<1x1x128xf32>
    tpu.vector_store %arg6[%c0_24, %c0_25, %c0_26], %60 {strides = array<i32>} : memref<1x1x128xf32, #tpu.memory_space<vmem>>, vector<1x1x128xf32>,
    return
  }
  func.func @transform_0(%arg0: i32) -> (i32, i32) {
    %c0_i32 = arith.constant 0 : i32
    %c0_i32_0 = arith.constant 0 : i32
    %c0_i32_1 = arith.constant 0 : i32
    return %c0_i32, %c0_i32_0 : i32, i32
  }
  func.func @transform_1(%arg0: i32) -> (i32, i32) {
    %c0_i32 = arith.constant 0 : i32
    %c0_i32_0 = arith.constant 0 : i32
    return %arg0, %c0_i32 : i32, i32
  }
  func.func @transform_2(%arg0: i32) -> (i32, i32) {
    %c0_i32 = arith.constant 0 : i32
    %c0_i32_0 = arith.constant 0 : i32
    %c0_i32_1 = arith.constant 0 : i32
    return %c0_i32, %c0_i32_0 : i32, i32
  }
  func.func @transform_3(%arg0: i32) -> (i32, i32, i32) {
    %c0_i32 = arith.constant 0 : i32
    %c0_i32_0 = arith.constant 0 : i32
    %c0_i32_1 = arith.constant 0 : i32
    return %arg0, %c0_i32, %c0_i32_0 : i32, i32, i32
  }
  func.func @transform_4(%arg0: i32) -> (i32, i32, i32) {
    %c0_i32 = arith.constant 0 : i32
    %c0_i32_0 = arith.constant 0 : i32
    %c0_i32_1 = arith.constant 0 : i32
    return %arg0, %c0_i32, %c0_i32_0 : i32, i32, i32
  }
  func.func @transform_5(%arg0: i32) -> (i32, i32, i32) {
    %c0_i32 = arith.constant 0 : i32
    %c0_i32_0 = arith.constant 0 : i32
    %c0_i32_1 = arith.constant 0 : i32
    return %arg0, %c0_i32, %c0_i32_0 : i32, i32, i32
  }
}

</mosaic_0001>

<bundles_post_ra>
// kernel: tpu_custom_call.1
= control target key start
LH: loop header
LB: loop body
LE: loop exit
PB: predicated region body
PF: predicated region fallthrough
CT: control target
= control target key end

     0   :  { %11 = vsyncpa [#allocation3], 0  ;;  %vm53_vm0 = vcmask 261120   ;;  %s1061_s0 = inlined_call_operand.vmem [shape: f32[8,32], index: 0, kind: input, shape index: {}]   ;;  %s1062_s1 = inlined_call_operand.vmem [shape: f32[128,32], index: 1, kind: input, shape index: {}]   ;;  %s1063_s2 = inlined_call_operand.vmem [shape: s32[8,1], index: 2, kind: input, shape index: {}]   ;;  %s1064_s3 = inlined_call_operand.hbm [shape: f32[1,1,128], index: 3, kind: output, shape index: {0}]   ;;  %s1065_s4 = inlined_call_operand.hbm [shape: f32[1,1,128], index: 4, kind: output, shape index: {1}]   ;;  %s1066_s5 = inlined_call_operand.hbm [shape: f32[1,1,128], index: 5, kind: output, shape index: {2}]  }
   0x1   :  { %v658_v0 = vld [vmem:[%s1062_s1 + $0x78] sm:$0xff]  ;;  %v663_v1 = vld [vmem:[%s1062_s1 + $0x68] sm:$0xff]  ;;  %v679_v6 = vld [vmem:[%s1062_s1 + $0x70] sm:$0xff] }
   0x2   :  { %v668_v2 = vld [vmem:[%s1062_s1 + $0x58] sm:$0xff]  ;;  %v52_v3 = vmul.f32 %v658_v0, %v658_v0  ;;  %v50_v4 = vmul.f32 %v663_v1, %v663_v1  ;;  %v684_v7 = vld [vmem:[%s1062_s1 + $0x60] sm:$0xff]  ;;  %v692_v11 = vld [vmem:[%s1062_s1 + $0x50] sm:$0xff]  ;;  %v51_v12 = vmul.f32 %v679_v6, %v679_v6 }
   0x3   :  { %v48_v5 = vmul.f32 %v668_v2, %v668_v2  ;;  %v49_v13 = vmul.f32 %v684_v7, %v684_v7 }
   0x4   :  { %v99_v8 = vsel %vm53_vm0, %v52_v3, 0.0  ;;  %v93_v9 = vsel %vm53_vm0, %v50_v4, 0.0 }
   0x5   :  { %v87_v10 = vsel %vm53_vm0, %v48_v5, 0.0  ;;  %100 = vadd.xlane.f32.xlu0 %v99_v8  ;;  %94 = vadd.xlane.f32.xlu1 %v93_v9 }
   0x6   :  { %88 = vadd.xlane.f32.xlu2 %v87_v10 }
   0x7   :  { %12 = vsyncpa [#allocation5], 0  ;;  %v47_v14 = vmul.f32 %v692_v11, %v692_v11  ;;  %v96_v15 = vsel %vm53_vm0, %v51_v12, 0.0  ;;  %v90_v16 = vsel %vm53_vm0, %v49_v13, 0.0  ;;  %v706_v18 = vld [vmem:[%s1062_s1 + $0x48] sm:$0xff]  ;;  %v711_v19 = vld [vmem:[%s1062_s1 + $0x40] sm:$0xff] }
   0x8   :  { %v716_v20 = vld [vmem:[%s1062_s1 + $0x38] sm:$0xff]  ;;  %v46_v21 = vmul.f32 %v706_v18, %v706_v18  ;;  %v45_v22 = vmul.f32 %v711_v19, %v711_v19  ;;  %v730_v27 = vld [vmem:[%s1062_s1 + $0x30] sm:$0xff]  ;;  %v735_v28 = vld [vmem:[%s1062_s1 + $0x28] sm:$0xff]  ;;  %s448_s30 = sshll.u32 %s1065_s4, 4  ;;  %s623_s6 = smov [#allocation6]   ;;  %s449_s30 = int_to_ptr.hbm [resolvable:$true] %s448_s30 }
   0x9   :  { %v84_v17 = vsel %vm53_vm0, %v47_v14, 0.0  ;;  %v44_v23 = vmul.f32 %v716_v20, %v716_v20  ;;  %v740_v29 = vld [vmem:[%s1062_s1 + $0x20] sm:$0xff]  ;;  %v43_v30 = vmul.f32 %v730_v27, %v730_v27  ;;  %v42_v31 = vmul.f32 %v735_v28, %v735_v28  ;;  %v754_v36 = vld [vmem:[%s1062_s1 + $0x18] sm:$0xff]  ;;  %v759_v37 = vld [vmem:[%s1062_s1 + $0x10] sm:$0xff]  ;;  %s457_s7 = sshll.u32 %s623_s6, 4  ;;  %s459_s10 = sshll.u32 %s1066_s5, 4  ;;  %s458_s7 = int_to_ptr.vmem [resolvable:$true] %s457_s7  ;;  %s460_s10 = int_to_ptr.hbm [resolvable:$true] %s459_s10 }
   0xa   :  { %v81_v24 = vsel %vm53_vm0, %v46_v21, 0.0  ;;  %v78_v25 = vsel %vm53_vm0, %v45_v22, 0.0  ;;  %v41_v32 = vmul.f32 %v740_v29, %v740_v29  ;;  %v764_v38 = vld [vmem:[%s1062_s1 + $0x8] sm:$0xff]  ;;  %v40_v39 = vmul.f32 %v754_v36, %v754_v36  ;;  %v778_v45 = vld [vmem:[%s1062_s1] sm:$0xff]  ;;  %s624_s4 = smov [#allocation2]   ;;  %s437_s5 = sshll.u32 %s1064_s3, 4  ;;  %s438_s5 = int_to_ptr.hbm [resolvable:$true] %s437_s5 }
   0xb   :  { %v75_v26 = vsel %vm53_vm0, %v44_v23, 0.0  ;;  %v72_v33 = vsel %vm53_vm0, %v43_v30, 0.0  ;;  %v69_v34 = vsel %vm53_vm0, %v42_v31, 0.0  ;;  %v39_v40 = vmul.f32 %v759_v37, %v759_v37  ;;  %s435_s11 = sshll.u32 %s624_s4, 4  ;;  %s436_s11 = int_to_ptr.vmem [resolvable:$true] %s435_s11 }
   0xc   :  { %v66_v35 = vsel %vm53_vm0, %v41_v32, 0.0  ;;  %v38_v41 = vmul.f32 %v764_v38, %v764_v38  ;;  %v63_v42 = vsel %vm53_vm0, %v40_v39, 0.0  ;;  %v37_v46 = vmul.f32 %v778_v45, %v778_v45 }
   0xd   :  { %97 = vadd.xlane.f32.xlu0 %v96_v15  ;;  %91 = vadd.xlane.f32.xlu1 %v90_v16  ;;  %v60_v43 = vsel %vm53_vm0, %v39_v40, 0.0 }
   0xe   :  { %85 = vadd.xlane.f32.xlu2 %v84_v17  ;;  %v57_v44 = vsel %vm53_vm0, %v38_v41, 0.0  ;;  %v54_v47 = vsel %vm53_vm0, %v37_v46, 0.0 }
  0x15   :  { %82 = vadd.xlane.f32.xlu0 %v81_v24  ;;  %79 = vadd.xlane.f32.xlu1 %v78_v25 }
  0x16   :  { %76 = vadd.xlane.f32.xlu2 %v75_v26 }
  0x1d   :  { %73 = vadd.xlane.f32.xlu0 %v72_v33  ;;  %70 = vadd.xlane.f32.xlu1 %v69_v34 }
  0x1e   :  { %67 = vadd.xlane.f32.xlu2 %v66_v35 }
  0x25   :  { %64 = vadd.xlane.f32.xlu0 %v63_v42  ;;  %61 = vadd.xlane.f32.xlu1 %v60_v43 }
  0x26   :  { %58 = vadd.xlane.f32.xlu2 %v57_v44 }
  0x2d   :  { %55 = vadd.xlane.f32.xlu0 %v54_v47 }
  0x78   :  { %v101_v48 = vpop.xlane.xlu0 %100  ;;  %v95_v49 = vpop.xlane.xlu1 %94 }
  0x79   :  { %v117_v50 = vadd.f32 1e-12, %v101_v48  ;;  %v783_v51 = vadd.f32 1e-12, %v95_v49  ;;  %v89_v52 = vpop.xlane.xlu2 %88 }
  0x7a   :  { %v786_v53 = vadd.f32 1e-12, %v89_v52 }
  0x7b   :  { %504 = vrsqrt.f32 %v117_v50  ;;  %vm274_vm2 = vweird.f32 %v117_v50  ;;  %vm254_vm4 = vweird.f32 %v783_v51 }
  0x7c   :  { %506 = vrsqrt.f32 %v783_v51  ;;  %vm234_vm12 = vweird.f32 %v786_v53 }
  0x7d   :  { %508 = vrsqrt.f32 %v786_v53 }
  0x80   :  { %v98_v54 = vpop.xlane.xlu0 %97  ;;  %v92_v55 = vpop.xlane.xlu1 %91 }
  0x81   :  { %v505_v56 = vpop.eup %504  ;;  %v116_v57 = vadd.f32 1e-12, %v98_v54  ;;  %v789_v58 = vadd.f32 1e-12, %v92_v55  ;;  %v86_v59 = vpop.xlane.xlu2 %85 }
  0x82   :  { %v791_v60 = vpop.eup %506  ;;  %v269_v61 = vmul.f32 %v505_v56, %v117_v50  ;;  %v793_v62 = vadd.f32 1e-12, %v86_v59  ;;  %vm275_vm1 = vweird.f32 %v505_v56 }
  0x83   :  { %v249_v63 = vmul.f32 %v791_v60, %v783_v51  ;;  %510 = vrsqrt.f32 %v116_v57  ;;  %v798_v4 = vpop.eup %508  ;;  %vm276_vm3 = vmor %vm274_vm2, %vm275_vm1  ;;  %vm255_vm6 = vweird.f32 %v791_v60  ;;  %vm264_vm7 = vweird.f32 %v116_v57 }
  0x84   :  { %v270_v3 = vmul.f32 %v505_v56, %v269_v61  ;;  %512 = vrsqrt.f32 %v789_v58  ;;  %v229_v13 = vmul.f32 %v798_v4, %v786_v53  ;;  %vm244_vm9 = vweird.f32 %v789_v58  ;;  %vm844_vm10 = vmor %vm254_vm4, %vm255_vm6 }
  0x85   :  { %514 = vrsqrt.f32 %v793_v62  ;;  %v250_v8 = vmul.f32 %v791_v60, %v249_v63  ;;  %vm235_vm13 = vweird.f32 %v798_v4  ;;  %vm224_vm1 = vweird.f32 %v793_v62 }
  0x86   :  { %v271_v5 = vmul.f32 0.5, %v270_v3  ;;  %v230_v30 = vmul.f32 %v798_v4, %v229_v13  ;;  %vm884_vm15 = vmor %vm234_vm12, %vm235_vm13 }
  0x87   :  { %v251_v23 = vmul.f32 0.5, %v250_v8 }
  0x88   :  { %v83_v9 = vpop.xlane.xlu0 %82  ;;  %v80_v10 = vpop.xlane.xlu1 %79  ;;  %v272_v17 = vsub.f32 1.5, %v271_v5  ;;  %v231_v46 = vmul.f32 0.5, %v230_v30 }
  0x89   :  { %v511_v12 = vpop.eup %510  ;;  %v804_v14 = vadd.f32 1e-12, %v83_v9  ;;  %v806_v15 = vadd.f32 1e-12, %v80_v10  ;;  %v77_v22 = vpop.xlane.xlu2 %76  ;;  %v252_v35 = vsub.f32 1.5, %v251_v23 }
  0x8a   :  { %v808_v16 = vpop.eup %512  ;;  %v259_v21 = vmul.f32 %v511_v12, %v116_v57  ;;  %v818_v32 = vadd.f32 1e-12, %v77_v22  ;;  %v273_v34 = vmul.f32 %v505_v56, %v272_v17  ;;  %vm265_vm5 = vweird.f32 %v511_v12 }
  0x8b   :  { %v239_v24 = vmul.f32 %v808_v16, %v789_v58  ;;  %516 = vrsqrt.f32 %v804_v14  ;;  %v813_v25 = vpop.eup %514  ;;  %v253_v59 = vmul.f32 %v791_v60, %v252_v35  ;;  %vm266_vm8 = vmor %vm264_vm7, %vm265_vm5  ;;  %v232_v61 = vsub.f32 1.5, %v231_v46 }
  0x8c   :  { %v260_v26 = vmul.f32 %v511_v12, %v259_v21  ;;  %518 = vrsqrt.f32 %v806_v15  ;;  %v219_v40 = vmul.f32 %v813_v25, %v793_v62  ;;  %v277_v42 = vsel %vm276_vm3, %v505_v56, %v273_v34 }
  0x8d   :  { %v240_v31 = vmul.f32 %v808_v16, %v239_v24  ;;  %520 = vrsqrt.f32 %v818_v32  ;;  %v293_v47 = vmul.f32 %v277_v42, %v658_v0  ;;  %vm245_vm11 = vweird.f32 %v808_v16 }
  0x8e   :  { %v261_v33 = vmul.f32 0.5, %v260_v26  ;;  %v220_v55 = vmul.f32 %v813_v25, %v219_v40  ;;  %v257_v51 = vsel %vm844_vm10, %v791_v60, %v253_v59  ;;  %vm870_vm14 = vmor %vm244_vm9, %vm245_vm11  ;;  %v233_v58 = vmul.f32 %v798_v4, %v232_v61 }
  0x8f   :  { %v241_v39 = vmul.f32 0.5, %v240_v31  ;;  %477 = vmatpush.xpose.msk.msra.mxu0 %vm53_vm0, %v293_v47  ;;  %v291_v22 = vmul.f32 %v257_v51, %v663_v1  ;;  %vm225_vm2 = vweird.f32 %v813_v25  ;;  %vm214_vm4 = vweird.f32 %v804_v14 }
  0x90   :  { %v262_v41 = vsub.f32 1.5, %v261_v33  ;;  %v74_v43 = vpop.xlane.xlu0 %73  ;;  %v71_v48 = vpop.xlane.xlu1 %70  ;;  %v221_v10 = vmul.f32 0.5, %v220_v55  ;;  %v237_v62 = vsel %vm884_vm15, %v798_v4, %v233_v58  ;;  %vm904_vm3 = vmor %vm224_vm1, %vm225_vm2  ;;  %vm204_vm6 = vweird.f32 %v806_v15 }
  0x91   :  { %v823_v44 = vpop.eup %516  ;;  %v828_v49 = vadd.f32 1e-12, %v74_v43  ;;  %v242_v54 = vsub.f32 1.5, %v241_v39  ;;  %v837_v0 = vadd.f32 1e-12, %v71_v48  ;;  %v68_v8 = vpop.xlane.xlu2 %67  ;;  %v289_v4 = vmul.f32 %v237_v62, %v668_v2 }
  0x92   :  { %v263_v50 = vmul.f32 %v511_v12, %v262_v41  ;;  %v830_v52 = vpop.eup %518  ;;  %v209_v56 = vmul.f32 %v823_v44, %v804_v14  ;;  %v222_v53 = vsub.f32 1.5, %v221_v10  ;;  %vm215_vm5 = vweird.f32 %v823_v44 }
  0x93   :  { %v199_v3 = vmul.f32 %v830_v52, %v806_v15  ;;  %522 = vrsqrt.f32 %v828_v49  ;;  %v853_v9 = vpop.eup %520  ;;  %v243_v13 = vmul.f32 %v808_v16, %v242_v54  ;;  %vm205_vm7 = vweird.f32 %v830_v52 }
  0x94   :  { %v267_v57 = vsel %vm266_vm8, %v511_v12, %v263_v50  ;;  %v210_v12 = vmul.f32 %v823_v44, %v209_v56  ;;  %524 = vrsqrt.f32 %v837_v0  ;;  %v189_v21 = vmul.f32 %v853_v9, %v818_v32  ;;  %vm933_vm8 = vmor %vm214_vm4, %vm215_vm5 }
  0x95   :  { %v292_v5 = vmul.f32 %v267_v57, %v679_v6  ;;  %v864_v6 = vadd.f32 1e-12, %v68_v8  ;;  %v200_v60 = vmul.f32 %v830_v52, %v199_v3  ;;  %v247_v26 = vsel %vm870_vm14, %v808_v16, %v243_v13  ;;  %vm948_vm9 = vmor %vm204_vm6, %vm205_vm7 }
  0x96   :  { %v211_v23 = vmul.f32 0.5, %v210_v12  ;;  %v190_v16 = vmul.f32 %v853_v9, %v189_v21  ;;  %v290_v35 = vmul.f32 %v247_v26, %v684_v7  ;;  %v223_v42 = vmul.f32 %v813_v25, %v222_v53 }
  0x97   :  { %478 = vmatpush.xpose.msk.msra.mxu0 %vm53_vm0, %v292_v5  ;;  %526 = vrsqrt.f32 %v864_v6  ;;  %v201_v33 = vmul.f32 0.5, %v200_v60  ;;  %vm194_vm10 = vweird.f32 %v818_v32  ;;  %vm195_vm11 = vweird.f32 %v853_v9 }
  0x98   :  { %v65_v24 = vpop.xlane.xlu0 %64  ;;  %v62_v39 = vpop.xlane.xlu1 %61  ;;  %v212_v40 = vsub.f32 1.5, %v211_v23  ;;  %v191_v47 = vmul.f32 0.5, %v190_v16  ;;  %v227_v56 = vsel %vm904_vm3, %v813_v25, %v223_v42  ;;  %vm968_vm12 = vmor %vm194_vm10, %vm195_vm11  ;;  %vm184_vm13 = vweird.f32 %v828_v49 }
  0x99   :  { %v882_v30 = vpop.eup %522  ;;  %v895_v34 = vadd.f32 1e-12, %v65_v24  ;;  %v912_v46 = vadd.f32 1e-12, %v62_v39  ;;  %v202_v50 = vsub.f32 1.5, %v201_v33  ;;  %v59_v55 = vpop.xlane.xlu2 %58  ;;  %v288_v15 = vmul.f32 %v227_v56, %v692_v11 }
  0x9a   :  { %v892_v1 = vpop.eup %524  ;;  %v179_v41 = vmul.f32 %v882_v30, %v828_v49  ;;  %v213_v59 = vmul.f32 %v823_v44, %v212_v40  ;;  %v939_v57 = vadd.f32 1e-12, %v59_v55  ;;  %v192_v63 = vsub.f32 1.5, %v191_v47 }
  0x9b   :  { %479 = vmatpush.xpose.msk.msra.mxu0 %vm53_vm0, %v291_v22  ;;  %v169_v7 = vmul.f32 %v892_v1, %v837_v0  ;;  %528 = vrsqrt.f32 %v895_v34  ;;  %v203_v14 = vmul.f32 %v830_v52, %v202_v50  ;;  %vm185_vm14 = vweird.f32 %v882_v30 }
  0x9c   :  { %v180_v54 = vmul.f32 %v882_v30, %v179_v41  ;;  %530 = vrsqrt.f32 %v912_v46  ;;  %v217_v8 = vsel %vm933_vm8, %v823_v44, %v213_v59  ;;  %v193_v22 = vmul.f32 %v853_v9, %v192_v63  ;;  %vm986_vm15 = vmor %vm184_vm13, %vm185_vm14 }
  0x9d   :  { %v917_v48 = vpop.eup %526  ;;  %v170_v2 = vmul.f32 %v892_v1, %v169_v7  ;;  %532 = vrsqrt.f32 %v939_v57  ;;  %v287_v13 = vmul.f32 %v217_v8, %v706_v18  ;;  %v207_v32 = vsel %vm948_vm9, %v830_v52, %v203_v14  ;;  %v20_v14 = vld [vmem:[%s1061_s0] sm:$0xff]  ;;  %s622_s0 = smov [#allocation4]  }
  0x9e   :  { %v159_v25 = vmul.f32 %v917_v48, %v864_v6  ;;  %v181_v3 = vmul.f32 0.5, %v180_v54  ;;  %v286_v52 = vmul.f32 %v207_v32, %v711_v19  ;;  %v197_v58 = vsel %vm968_vm12, %v853_v9, %v193_v22  ;;  %s446_s27 = sshll.u32 %s622_s0, 4  ;;  %s447_s27 = int_to_ptr.vmem [resolvable:$true] %s446_s27 }
  0x9f   :  { %480 = vmatpush.xpose.msk.msra.mxu0 %vm53_vm0, %v290_v35  ;;  %v171_v11 = vmul.f32 0.5, %v170_v2  ;;  %vm174_vm1 = vweird.f32 %v837_v0  ;;  %vm175_vm2 = vweird.f32 %v892_v1  ;;  %v285_v35 = vmul.f32 %v197_v58, %v716_v20  ;;  %v298_v0 = vld [vmem:[%s1063_s2] sm:$0xff] }
  0xa0   :  { %v56_v5 = vpop.xlane.xlu0 %55  ;;  %v160_v51 = vmul.f32 %v917_v48, %v159_v25  ;;  %v182_v60 = vsub.f32 1.5, %v181_v3  ;;  %vm1004_vm3 = vmor %vm174_vm1, %vm175_vm2  ;;  %v620_v20 = vmov 0   ;;  %vm164_vm4 = vweird.f32 %v864_v6 }
  0xa1   :  { %v946_v10 = vpop.eup %528  ;;  %v957_v44 = vadd.f32 1e-12, %v56_v5  ;;  %v172_v18 = vsub.f32 1.5, %v171_v11  ;;  %502 = vset.pattern.permute.xlu1 %v620_v20  ;;  %vm165_vm5 = vweird.f32 %v917_v48  ;;  %503 = vset.pattern.permute.xlu0 %v620_v20  ;;  %vm154_vm7 = vweird.f32 %v895_v34 }
  0xa2   :  { %v960_v17 = vpop.eup %530  ;;  %v149_v21 = vmul.f32 %v946_v10, %v895_v34  ;;  %v161_v23 = vmul.f32 0.5, %v160_v51  ;;  %v183_v31 = vmul.f32 %v882_v30, %v182_v60  ;;  %300 = vperm.xlu1 %502, %v298_v0   ;;  %vm166_vm6 = vmor %vm164_vm4, %vm165_vm5  ;;  %vm155_vm8 = vweird.f32 %v946_v10 }
  0xa3   :  { %481 = vmatpush.xpose.msk.msra.mxu0 %vm53_vm0, %v289_v4  ;;  %v139_v24 = vmul.f32 %v960_v17, %v912_v46  ;;  %534 = vrsqrt.f32 %v957_v44  ;;  %v984_v49 = vpop.eup %532  ;;  %v173_v9 = vmul.f32 %v892_v1, %v172_v18  ;;  %vm156_vm9 = vmor %vm154_vm7, %vm155_vm8  ;;  %vm144_vm10 = vweird.f32 %v912_v46 }
  0xa4   :  { %v150_v26 = vmul.f32 %v946_v10, %v149_v21  ;;  %v162_v19 = vsub.f32 1.5, %v161_v23  ;;  %v129_v40 = vmul.f32 %v984_v49, %v939_v57  ;;  %v187_v41 = vsel %vm986_vm15, %v882_v30, %v183_v31 }
  0xa5   :  { %v140_v16 = vmul.f32 %v960_v17, %v139_v24  ;;  %v284_v43 = vmul.f32 %v187_v41, %v730_v27  ;;  %v177_v54 = vsel %vm1004_vm3, %v892_v1, %v173_v9  ;;  %vm145_vm11 = vweird.f32 %v960_v17 }
  0xa6   :  { %v151_v39 = vmul.f32 0.5, %v150_v26  ;;  %v163_v7 = vmul.f32 %v917_v48, %v162_v19  ;;  %v130_v4 = vmul.f32 %v984_v49, %v129_v40  ;;  %v283_v27 = vmul.f32 %v177_v54, %v735_v28  ;;  %vm146_vm12 = vmor %vm144_vm10, %vm145_vm11 }
  0xa7   :  { %482 = vmatpush.xpose.msk.msra.mxu0 %vm53_vm0, %v288_v15  ;;  %v141_v30 = vmul.f32 0.5, %v140_v16  ;;  %vm134_vm13 = vweird.f32 %v939_v57  ;;  %vm135_vm14 = vweird.f32 %v984_v49  ;;  %vm124_vm1 = vweird.f32 %v957_v44 }
  0xa8   :  { %v152_v47 = vsub.f32 1.5, %v151_v39  ;;  %v131_v55 = vmul.f32 0.5, %v130_v4  ;;  %v167_v59 = vsel %vm166_vm6, %v917_v48, %v163_v7  ;;  %vm136_vm15 = vmor %vm134_vm13, %vm135_vm14 }
  0xa9   :  { %v535_v62 = vpop.eup %534  ;;  %v142_v6 = vsub.f32 1.5, %v141_v30  ;;  %v282_v1 = vmul.f32 %v167_v59, %v740_v29 }
  0xaa   :  { %v119_v50 = vmul.f32 %v535_v62, %v957_v44  ;;  %v153_v2 = vmul.f32 %v946_v10, %v152_v47  ;;  %v132_v34 = vsub.f32 1.5, %v131_v55  ;;  %vm125_vm2 = vweird.f32 %v535_v62 }
  0xab   :  { %483 = vmatpush.xpose.msk.msra.mxu0 %vm53_vm0, %v287_v13  ;;  %v143_v28 = vmul.f32 %v960_v17, %v142_v6  ;;  %vm126_vm3 = vmor %vm124_vm1, %vm125_vm2  ;;  %v621_v13 = vmov 0.0  }
  0xac   :  { %v120_v56 = vmul.f32 %v535_v62, %v119_v50  ;;  %v157_v25 = vsel %vm156_vm9, %v946_v10, %v153_v2  ;;  %v133_v46 = vmul.f32 %v984_v49, %v132_v34 }
  0xad   :  { %v281_v48 = vmul.f32 %v157_v25, %v754_v36  ;;  %v147_v29 = vsel %vm146_vm12, %v960_v17, %v143_v28 }
  0xae   :  { %v121_v61 = vmul.f32 0.5, %v120_v56  ;;  %v280_v63 = vmul.f32 %v147_v29, %v759_v37  ;;  %v137_v57 = vsel %vm136_vm15, %v984_v49, %v133_v46  ;;  %v294_v37 = vlaneseq }
  0xaf   :  { %484 = vmatpush.xpose.msk.msra.mxu0 %vm53_vm0, %v286_v52  ;;  %v279_v36 = vmul.f32 %v137_v57, %v764_v38 }
  0xb0   :  { %v122_v15 = vsub.f32 1.5, %v121_v61  ;;  %v295_v12 = vand.u32 127, %v294_v37 }
  0xb2   :  { %v123_v3 = vmul.f32 %v535_v62, %v122_v15  ;;  %vm414_vm5 = vcmp.lt.s32.totalorder %v295_v12, 16 }
  0xb3   :  { %485 = vmatpush.xpose.msk.msra.mxu0 %vm53_vm0, %v285_v35  ;;  %v495_v9 = vsel %vm414_vm5, 1.0, %v621_v13 }
  0xb4   :  { %v127_v5 = vsel %vm126_vm3, %v535_v62, %v123_v3 }
  0xb5   :  { %v278_v8 = vmul.f32 %v127_v5, %v778_v45 }
  0xb7   :  { %486 = vmatpush.xpose.msk.msra.mxu0 %vm53_vm0, %v284_v43 }
  0xbb   :  { %487 = vmatpush.xpose.msk.msra.mxu0 %vm53_vm0, %v283_v27 }
  0xbf   :  { %488 = vmatpush.xpose.msk.msra.mxu0 %vm53_vm0, %v282_v1 }
  0xc3   :  { %489 = vmatpush.xpose.msk.msra.mxu0 %vm53_vm0, %v281_v48 }
  0xc7   :  { %490 = vmatpush.xpose.msk.msra.mxu0 %vm53_vm0, %v280_v63 }
  0xcb   :  { %491 = vmatpush.xpose.msk.msra.mxu0 %vm53_vm0, %v279_v36 }
  0xcf   :  { %492 = vmatpush.xpose.msk.msra.mxu0 %vm53_vm0, %v278_v8 }
  0xd2   :  { %493 = vmatmul.msk.f32.vlgmr.msra.gmra.mxu0 %vm53_vm0, %v20_v14 }
 0x114   :  { %v301_v51 = vpop.permute.xlu1 %300 }
 0x115   :  { %vm302_vm4 = vcmp.eq.s32.totalorder %v295_v12, %v301_v51 }
 0x116   :  { %v494_v17 = vsel %vm302_vm4, 1.0, %v621_v13 }
 0x117   :  { %v408_v45 = vrot.slane %v494_v17, 4 }
 0x119   :  { %v409_v60 = vadd.f32 %v494_v17, %v408_v45 }
 0x11b   :  { %v410_v21 = vrot.slane %v409_v60, 2 }
 0x11d   :  { %v411_v32 = vadd.f32 %v410_v21, %v409_v60 }
 0x11f   :  { %v412_v18 = vrot.slane %v411_v32, 1 }
 0x121   :  { %v413_v24 = vadd.f32 %v412_v18, %v411_v32 }
 0x123   :  { %vm426_vm0 = vcmp.gt.f32.partialorder %v413_v24, 0.0 }
 0x124   :  { %v496_v31 = vsel %vm426_vm0, 1.0, %v621_v13 }
 0x125   :  { %429 = vst [vmem:[#allocation6] sm:$0x1] %v496_v31 }
 0x14f   :  { %v371_v10 = vpop.f32.mrf.mxu0 }
 0x150   :  { %v372_v11 = vadd.f32 0.1, %v371_v10 }
 0x152   :  { %v374_v44 = vmul.f32 32.0, %v372_v11 }
 0x154   :  { %v375_v38 = vmul.f32 1.442695, %v374_v44 }
 0x156   :  { %536 = vpow2.f32 %v375_v38 }
 0x15c   :  { %v537_v22 = vpop.eup %536 }
 0x15d   :  { %538 = vrcp.f32 %v537_v22  ;;  %v393_v53 = vsel %vm302_vm4, 0.0, %v537_v22  ;;  %v388_v16 = vand.u32 2147483648, %v537_v22  ;;  %v386_v40 = vand.u32 2147483647, %v537_v22 }
 0x15e   :  { %v400_v23 = vrot.slane %v393_v53, 4  ;;  %vm382_vm7 = vweird.f32 %v537_v22 }
 0x15f   :  { %v389_v62 = vor.u32 1.1754944e-38, %v388_v16  ;;  %vm387_vm9 = vcmp.eq.f32.partialorder %v386_v40, 8.507059e+37 }
 0x160   :  { %v401_v52 = vadd.f32 %v400_v23, %v393_v53 }
 0x162   :  { %v402_v58 = vrot.slane %v401_v52, 2 }
 0x163   :  { %v539_v26 = vpop.eup %538 }
 0x164   :  { %v378_v49 = vmul.f32 %v539_v26, %v537_v22  ;;  %v403_v33 = vadd.f32 %v402_v58, %v401_v52  ;;  %vm383_vm6 = vweird.f32 %v539_v26 }
 0x165   :  { %vm384_vm8 = vmor %vm382_vm7, %vm383_vm6 }
 0x166   :  { %v379_v19 = vsub.f32 1.0, %v378_v49  ;;  %v404_v35 = vrot.slane %v403_v33, 1 }
 0x168   :  { %v380_v39 = vmul.f32 %v539_v26, %v379_v19  ;;  %v405_v41 = vadd.f32 %v404_v35, %v403_v33 }
 0x16a   :  { %v381_v0 = vadd.f32 %v539_v26, %v380_v39  ;;  %v417_v42 = vmul.f32 %v495_v9, %v405_v41 }
 0x16c   :  { %v385_v20 = vsel %vm384_vm8, %v539_v26, %v381_v0  ;;  %v422_v43 = vadd.f32 1.0, %v417_v42 }
 0x16d   :  { %v390_v30 = vsel %vm387_vm9, %v389_v62, %v385_v20 }
 0x16e   :  { %v391_v7 = vmul.f32 601.84503, %v390_v30  ;;  %540 = vlog2.f32 %v422_v43 }
 0x170   :  { %v392_v47 = vsel %vm302_vm4, %v391_v7, 0.0 }
 0x171   :  { %v394_v4 = vrot.slane %v392_v47, 4 }
 0x173   :  { %v395_v50 = vadd.f32 %v394_v4, %v392_v47 }
 0x174   :  { %v541_v54 = vpop.eup %540 }
 0x175   :  { %v396_v6 = vrot.slane %v395_v50, 2  ;;  %v424_v27 = vmul.f32 0.6931472, %v541_v54 }
 0x177   :  { %v397_v55 = vadd.f32 %v396_v6, %v395_v50  ;;  %425 = vst [vmem:[#allocation4] sm:$0x1] %v424_v27 }
 0x178   :  { %451 = dma.vmem_to_hbm [thread:$0]  %s447_s27, 16, %s449_s30, [#allocation5]  }
 0x179   :  { %v398_v56 = vrot.slane %v397_v55, 1  ;;  %462 = dma.vmem_to_hbm [thread:$0]  %s458_s7, 16, %s460_s10, [#allocation5]  }
 0x17b   :  { %v399_v59 = vadd.f32 %v398_v56, %v397_v55 }
 0x17d   :  { %v418_v2 = vadd.f32 1.0, %v399_v59 }
 0x17f   :  { %542 = vlog2.f32 %v418_v2 }
 0x185   :  { %v543_v1 = vpop.eup %542 }
 0x186   :  { %v420_v34 = vmul.f32 0.6931472, %v543_v1 }
 0x188   :  { %421 = vst [vmem:[#allocation2] sm:$0x1] %v420_v34 }
 0x189   :  { %440 = dma.vmem_to_hbm [thread:$0]  %s436_s11, 16, %s438_s5, [#allocation3]  }
 0x18a   :  { %616 = dma.done.wait [#allocation3], 16  }
 0x18b   :  { %617 = vsyncadd [#allocation3], 4294967280 }
 0x18c   :  { %618 = dma.done.wait [#allocation5], 32  }
 0x18d   :  { %619 = vsyncadd [#allocation5], 4294967264 }
 0x18e   :  { %475 = vsyncpa [#allocation3], 1 }
 0x18f   :  { %476 = vsyncpa [#allocation5], 1 }

</bundles_post_ra>
